<compile_context>
chip_gen: v7x
topology: tpu7x:2x2x1
jax: 0.10.0
libtpu: 0.0.40
codegen_flags: <defaults>
</compile_context>

<pallas_src>
import jax
import jax.numpy as jnp
from jax.experimental import pallas as pl
from jax.experimental.pallas import tpu as pltpu


def bay_loss_kernel(prob_ref, den_ref, tgt_ref, out_ref, pc_ref):
    # prob_ref: (Bb, N, Tp)   den_ref: (Bb, 1, Tp)   tgt_ref: (Bb, N, 1)
    # out_ref : (Bb, 8, 128)  per-sample loss broadcast into a full vreg
    # pc_ref  : (Bb, N, 128)  f32 lane-bucket partial sums, persistent across P tiles
    p = pl.program_id(1)

    @pl.when(p == 0)
    def _():
        pc_ref[...] = jnp.zeros_like(pc_ref)

    # Upcast to f32 inside the kernel; accumulate in f32.
    w = prob_ref[...].astype(jnp.float32) * den_ref[...].astype(jnp.float32)

    # Fold the Tp lanes into 128 lane buckets with VPU adds only (no XLU per tile).
    tp = w.shape[-1]
    acc = w[..., 0:128]
    for k in range(1, tp // 128):
        acc = acc + w[..., k * 128:(k + 1) * 128]
    pc_ref[...] += acc

    @pl.when(p == pl.num_programs(1) - 1)
    def _():
        # One cross-lane (XLU) reduce per sample, once all P tiles are folded in.
        pre_count = jnp.sum(pc_ref[...], axis=-1, keepdims=True)      # (Bb, N, 1)
        tgt = tgt_ref[...].astype(jnp.float32)                        # (Bb, N, 1)
        diff = jnp.abs(tgt - pre_count)                               # (Bb, N, 1)
        loss_b = jnp.sum(diff, axis=1, keepdims=True)                 # (Bb, 1, 1)
        out_ref[...] = jnp.broadcast_to(loss_b, out_ref.shape)


def bay_loss(prob, pre_density, target_list, use_background=True,
             tile_bytes=2 * 1024 * 1024, max_lanes=8192):
    """prob: (B, N, P); pre_density: (B, 1, H, W) NCHW with H*W == P;
       target_list: (B, N-1) if use_background else (B, N)."""
    B, N, P = prob.shape
    assert pre_density.shape[0] == B and pre_density.shape[1] == 1
    assert pre_density.shape[2] * pre_density.shape[3] == P

    density = pre_density.reshape(B, 1, P)

    if use_background:
        assert target_list.shape == (B, N - 1)
        target = jnp.concatenate(
            [target_list.astype(jnp.float32), jnp.zeros((B, 1), jnp.float32)],
            axis=1)
    else:
        assert target_list.shape == (B, N)
        target = target_list.astype(jnp.float32)

    itemsize = jnp.dtype(prob.dtype).itemsize

    # ---- tile-size selection -------------------------------------------------
    n_pad = ((N + 7) // 8) * 8                                        # sublane multiple
    max_tp = max(128, (tile_bytes // (n_pad * itemsize)) // 128 * 128)
    max_tp = min(max_tp, max_lanes)
    p_pad128 = ((P + 127) // 128) * 128
    tp = min(max_tp, p_pad128)
    p_pad = ((P + tp - 1) // tp) * tp

    # Samples per grid step (amortizes per-step overhead when N*P is small).
    per_sample_bytes = n_pad * tp * itemsize
    bb = 1
    for cand in range(1, B + 1):
        if B % cand == 0 and cand * per_sample_bytes <= tile_bytes:
            bb = cand

    # ---- zero-pad ragged dims (padded rows / pixels contribute exactly 0) ----
    if n_pad != N or p_pad != P:
        prob = jnp.pad(prob, ((0, 0), (0, n_pad - N), (0, p_pad - P)))
    if p_pad != P:
        density = jnp.pad(density, ((0, 0), (0, 0), (0, p_pad - P)))
    if n_pad != N:
        target = jnp.pad(target, ((0, 0), (0, n_pad - N)))
    target = target.reshape(B, n_pad, 1)

    grid = (B // bb, p_pad // tp)

    out = pl.pallas_call(
        bay_loss_kernel,
        out_shape=jax.ShapeDtypeStruct((B, 8, 128), jnp.float32),
        grid=grid,
        in_specs=[
            pl.BlockSpec((bb, n_pad, tp), lambda b, p: (b, 0, p)),
            pl.BlockSpec((bb, 1, tp), lambda b, p: (b, 0, p)),
            pl.BlockSpec((bb, n_pad, 1), lambda b, p: (b, 0, 0)),
        ],
        out_specs=pl.BlockSpec((bb, 8, 128), lambda b, p: (b, 0, 0)),
        scratch_shapes=[pltpu.VMEM((bb, n_pad, 128), jnp.float32)],
        compiler_params=pltpu.CompilerParams(
            dimension_semantics=("parallel", "arbitrary"),
            vmem_limit_bytes=32 * 1024 * 1024,
        ),
    )(prob, density, target)

    # Final reduction over samples + normalization in plain JAX.
    return jnp.sum(out[:, 0, 0]) / B


def bay_loss_reference(prob, pre_density, target_list, use_background=True):
    """Pure-JAX reference mirroring the PyTorch forward (non-None path)."""
    B, N, P = prob.shape
    loss = 0.0
    for idx in range(B):
        if use_background:
            target = jnp.concatenate(
                [target_list[idx].astype(jnp.float32), jnp.zeros((1,), jnp.float32)])
        else:
            target = target_list[idx].astype(jnp.float32)
        pre_count = jnp.sum(
            pre_density[idx].reshape(1, -1).astype(jnp.float32)
            * prob[idx].astype(jnp.float32), axis=1)
        loss += jnp.sum(jnp.abs(target - pre_count))
    return loss / B


def _make_inputs(key, B, N, H, W):
    k1, k2, k3 = jax.random.split(key, 3)
    P = H * W
    logits = jax.random.normal(k1, (B, N, P), dtype=jnp.float32)
    prob = jax.nn.softmax(logits, axis=-1)
    pre_density = jax.nn.relu(jax.random.normal(k2, (B, 1, H, W), dtype=jnp.float32))
    target_list = jax.random.uniform(k3, (B, N - 1), dtype=jnp.float32)
    return prob, pre_density, target_list


if __name__ == "__main__":
    key = jax.random.PRNGKey(0)
    k_a, k_b, k_c = jax.random.split(key, 3)

    # 1) base demo shape: B=2, N=8 (7 points + background), 16x16 density map.
    prob, den, tgt = _make_inputs(k_a, B=2, N=8, H=16, W=16)
    loss = jax.block_until_ready(bay_loss(prob, den, tgt, use_background=True))
    ref = bay_loss_reference(prob, den, tgt, use_background=True)
    assert jnp.allclose(loss, ref, rtol=1e-5, atol=1e-5), (loss, ref)

    # 2) ragged shapes: N not a multiple of 8, P not a multiple of 128 (pads to 0).
    prob, den, tgt = _make_inputs(k_b, B=3, N=13, H=10, W=12)
    loss = jax.block_until_ready(bay_loss(prob, den, tgt, use_background=True))
    ref = bay_loss_reference(prob, den, tgt, use_background=True)
    assert jnp.allclose(loss, ref, rtol=1e-5, atol=1e-5), (loss, ref)

    # 3) multi-tile grid: small tile budget forces several P tiles per sample,
    #    exercising the persistent scratch accumulator and per-sample outputs.
    prob, den, tgt = _make_inputs(k_c, B=2, N=8, H=32, W=32)
    loss = jax.block_until_ready(
        bay_loss(prob, den, tgt, use_background=True, tile_bytes=8192))
    ref = bay_loss_reference(prob, den, tgt, use_background=True)
    assert jnp.allclose(loss, ref, rtol=1e-5, atol=1e-5), (loss, ref)

    print("KERNEL_OK")
</pallas_src>

<mosaic_0001>
module attributes {stable_mosaic.version = 11 : i64} {
  func.func @bay_loss_kernel(%arg0: i32, %arg1: i32, %arg2: memref<2x8x256xf32, #tpu.memory_space<vmem>>, %arg3: memref<2x1x256xf32, #tpu.memory_space<vmem>>, %arg4: memref<2x8x1xf32, #tpu.memory_space<vmem>>, %arg5: memref<2x8x128xf32, #tpu.memory_space<vmem>>, %arg6: memref<2x8x128xf32, #tpu.memory_space<vmem>>) attributes {dimension_semantics = [#tpu.dimension_semantics<parallel>, #tpu.dimension_semantics<arbitrary>], iteration_bounds = array<i64: 1, 1>, scalar_prefetch = 0 : i64, scratch_operands = 1 : i64, tpu.core_type = #tpu.core_type<tc>, window_params = [{transform_indices = @transform_0, window_bounds = array<i64: 2, 8, 256>}, {transform_indices = @transform_1, window_bounds = array<i64: 2, 1, 256>}, {transform_indices = @transform_2, window_bounds = array<i64: 2, 8, 1>}, {transform_indices = @transform_3, window_bounds = array<i64: 2, 8, 128>}]} {
    %c0_i32 = arith.constant 0 : i32
    %0 = arith.cmpi eq, %arg1, %c0_i32 : i32
    %1 = arith.extui %0 : i1 to i32
    %c0_i32_0 = arith.constant 0 : i32
    %2 = arith.cmpi ne, %1, %c0_i32_0 : i32
    scf.if %2 {
      %cst = arith.constant 0.000000e+00 : f32
      %16 = vector.broadcast %cst : f32 to vector<2x8x128xf32>
      %c0_14 = arith.constant 0 : index
      %c0_15 = arith.constant 0 : index
      %c0_16 = arith.constant 0 : index
      %17 = vector.load %arg6[%c0_14, %c0_15, %c0_16] : memref<2x8x128xf32, #tpu.memory_space<vmem>>, vector<2x8x128xf32>
      tpu.vector_store %arg6[%c0_14, %c0_15, %c0_16], %16 {strides = array<i32>} : memref<2x8x128xf32, #tpu.memory_space<vmem>>, vector<2x8x128xf32>,
    } else {
    }
    %c0 = arith.constant 0 : index
    %c0_1 = arith.constant 0 : index
    %c0_2 = arith.constant 0 : index
    %3 = vector.load %arg2[%c0, %c0_1, %c0_2] : memref<2x8x256xf32, #tpu.memory_space<vmem>>, vector<2x8x256xf32>
    %c0_3 = arith.constant 0 : index
    %c0_4 = arith.constant 0 : index
    %c0_5 = arith.constant 0 : index
    %4 = vector.load %arg3[%c0_3, %c0_4, %c0_5] : memref<2x1x256xf32, #tpu.memory_space<vmem>>, vector<2x1x256xf32>
    %5 = vector.broadcast %4 : vector<2x1x256xf32> to vector<2x8x256xf32>
    %6 = arith.mulf %3, %5 : vector<2x8x256xf32>
    %7 = vector.extract_strided_slice %6 {offsets = [0, 0, 0], sizes = [2, 8, 128], strides = [1, 1, 1]} : vector<2x8x256xf32> to vector<2x8x128xf32>
    %8 = vector.extract_strided_slice %6 {offsets = [0, 0, 128], sizes = [2, 8, 128], strides = [1, 1, 1]} : vector<2x8x256xf32> to vector<2x8x128xf32>
    %9 = arith.addf %7, %8 : vector<2x8x128xf32>
    %c0_6 = arith.constant 0 : index
    %c0_7 = arith.constant 0 : index
    %c0_8 = arith.constant 0 : index
    %10 = vector.load %arg6[%c0_6, %c0_7, %c0_8] : memref<2x8x128xf32, #tpu.memory_space<vmem>>, vector<2x8x128xf32>
    %11 = arith.addf %10, %9 : vector<2x8x128xf32>
    %c0_9 = arith.constant 0 : index
    %c0_10 = arith.constant 0 : index
    %c0_11 = arith.constant 0 : index
    %12 = vector.load %arg6[%c0_9, %c0_10, %c0_11] : memref<2x8x128xf32, #tpu.memory_space<vmem>>, vector<2x8x128xf32>
    tpu.vector_store %arg6[%c0_9, %c0_10, %c0_11], %11 {strides = array<i32>} : memref<2x8x128xf32, #tpu.memory_space<vmem>>, vector<2x8x128xf32>,
    %c0_i32_12 = arith.constant 0 : i32
    %13 = arith.cmpi eq, %arg1, %c0_i32_12 : i32
    %14 = arith.extui %13 : i1 to i32
    %c0_i32_13 = arith.constant 0 : i32
    %15 = arith.cmpi ne, %14, %c0_i32_13 : i32
    scf.if %15 {
      %c0_14 = arith.constant 0 : index
      %c0_15 = arith.constant 0 : index
      %c0_16 = arith.constant 0 : index
      %16 = vector.load %arg6[%c0_14, %c0_15, %c0_16] : memref<2x8x128xf32, #tpu.memory_space<vmem>>, vector<2x8x128xf32>
      %cst = arith.constant dense<0.000000e+00> : vector<2x8xf32>
      %17 = vector.multi_reduction <add>, %16, %cst [2] : vector<2x8x128xf32> to vector<2x8xf32>
      %18 = vector.shape_cast %17 : vector<2x8xf32> to vector<2x8x1xf32>
      %c0_17 = arith.constant 0 : index
      %c0_18 = arith.constant 0 : index
      %c0_19 = arith.constant 0 : index
      %19 = vector.load %arg4[%c0_17, %c0_18, %c0_19] : memref<2x8x1xf32, #tpu.memory_space<vmem>>, vector<2x8x1xf32>
      %20 = arith.subf %19, %18 : vector<2x8x1xf32>
      %21 = math.absf %20 : vector<2x8x1xf32>
      %cst_20 = arith.constant dense<0.000000e+00> : vector<2x1xf32>
      %22 = vector.multi_reduction <add>, %21, %cst_20 [1] : vector<2x8x1xf32> to vector<2x1xf32>
      %23 = vector.shape_cast %22 : vector<2x1xf32> to vector<2x1x1xf32>
      %24 = vector.shape_cast %23 : vector<2x1x1xf32> to vector<2x1x1xf32>
      %25 = vector.broadcast %24 : vector<2x1x1xf32> to vector<2x8x128xf32>
      %c0_21 = arith.constant 0 : index
      %c0_22 = arith.constant 0 : index
      %c0_23 = arith.constant 0 : index
      %26 = vector.load %arg5[%c0_21, %c0_22, %c0_23] : memref<2x8x128xf32, #tpu.memory_space<vmem>>, vector<2x8x128xf32>
      tpu.vector_store %arg5[%c0_21, %c0_22, %c0_23], %25 {strides = array<i32>} : memref<2x8x128xf32, #tpu.memory_space<vmem>>, vector<2x8x128xf32>,
    } else {
    }
    return
  }
  func.func @transform_0(%arg0: i32, %arg1: i32) -> (i32, i32, i32) {
    %c0_i32 = arith.constant 0 : i32
    %c0_i32_0 = arith.constant 0 : i32
    return %arg0, %c0_i32, %arg1 : i32, i32, i32
  }
  func.func @transform_1(%arg0: i32, %arg1: i32) -> (i32, i32, i32) {
    %c0_i32 = arith.constant 0 : i32
    %c0_i32_0 = arith.constant 0 : i32
    return %arg0, %c0_i32, %arg1 : i32, i32, i32
  }
  func.func @transform_2(%arg0: i32, %arg1: i32) -> (i32, i32, i32) {
    %c0_i32 = arith.constant 0 : i32
    %c0_i32_0 = arith.constant 0 : i32
    %c0_i32_1 = arith.constant 0 : i32
    return %arg0, %c0_i32, %c0_i32_0 : i32, i32, i32
  }
  func.func @transform_3(%arg0: i32, %arg1: i32) -> (i32, i32, i32) {
    %c0_i32 = arith.constant 0 : i32
    %c0_i32_0 = arith.constant 0 : i32
    %c0_i32_1 = arith.constant 0 : i32
    return %arg0, %c0_i32, %c0_i32_0 : i32, i32, i32
  }
}

</mosaic_0001>

<bundles_post_ra>
// kernel: tpu_custom_call.1
= control target key start
LH: loop header
LB: loop body
LE: loop exit
PB: predicated region body
PF: predicated region fallthrough
CT: control target
= control target key end

     0   :  { %8 = vsyncpa [#allocation4], 0  ;;  %s254_s0 = inlined_call_operand.hbm [shape: f32[2,8,256], index: 0, kind: input, shape index: {}]   ;;  %s255_s1 = inlined_call_operand.vmem [shape: f32[2,1,256], index: 1, kind: input, shape index: {}]   ;;  %s256_s2 = inlined_call_operand.vmem [shape: f32[2,8,1], index: 2, kind: input, shape index: {}]   ;;  %s257_s3 = inlined_call_operand.hbm [shape: f32[2,8,128], index: 3, kind: output, shape index: {}]  }
   0x1   :  { %9 = vsyncpa [#allocation5], 0  ;;  %s191_s12 = smov [#allocation3]   ;;  %s143_s16 = scalar_lea.hbm %s254_s0, 512 }
   0x2   :  { %s15_s13 = sshll.u32 %s191_s12, 4  ;;  %p144_p0 = scmp.ne.s32.totalorder %s254_s0, %s143_s16  ;;  %s16_s13 = int_to_ptr.vmem [resolvable:$true] %s15_s13 }
   0x3   :  { %p147_p1 = scmp.lt.u32.totalorder %s143_s16, %s254_s0 }
   0x5   :  { %p149_p2 = pnand %p147_p1, %p144_p0 }
   0x7   :  { %152 = shalt.err (!%p149_p2)
}
   0x8   :  { %s153_s21 = scalar_lea.vmem %s16_s13, 512  ;;  %p158_p4 = scmp.lt.s32.totalorder %s16_s13, %s16_s13 }
   0x9   :  { %p154_p3 = scmp.ne.s32.totalorder %s16_s13, %s153_s21  ;;  %p159_p5 = scmp.lt.s32.totalorder %s153_s21, %s153_s21 }
   0xb   :  { %p160_p6 = por %p159_p5, %p158_p4 }
   0xd   :  { %p161_p7 = pnand %p160_p6, %p154_p3 }
   0xf   :  { %164 = shalt.err (!%p161_p7)
}
  0x10   :  { %s192_s22 = smov 256   ;;  %s193_s23 = smov 16  }
  0x11   :  { %21 = dma.hbm_to_vmem [thread:$0]  %s254_s0, 512, %s16_s13, [#allocation4], %s192_s22, %s192_s22, %s193_s23  }
  0x12   :  { %187 = dma.done.wait [#allocation4], 512  }
  0x13   :  { %188 = vsyncadd [#allocation4], 4294966784  ;;  %v43_v0 = vlaneseq  ;;  %v35_v4 = vld [vmem:[#allocation3] sm:$0xff]  ;;  %v36_v5 = vld [vmem:[#allocation3 + $0x8] sm:$0xff]  ;;  %v194_v20 = vmov 0   ;;  %vm90_vm0 = vcmask 7168  }
  0x14   :  { %v39_v6 = vld [vmem:[%s255_s1] sm:$0x3]  ;;  %v37_v9 = vld [vmem:[#allocation3 + $0x10] sm:$0xff]  ;;  %v38_v10 = vld [vmem:[#allocation3 + $0x18] sm:$0xff]  ;;  %141 = vset.pattern.permute.xlu1 %v194_v20  ;;  %142 = vset.pattern.permute.xlu0 %v194_v20 }
  0x15   :  { %v44_v1 = vshrl.u32 %v43_v0, 7  ;;  %v40_v11 = vld [vmem:[%s255_s1 + $0x2] sm:$0x3]  ;;  %v85_v24 = vld [vmem:[%s256_s2 + $0x8] sm:$0xff] }
  0x16   :  { %v84_v21 = vld [vmem:[%s256_s2] sm:$0xff]  ;;  %s195_s2 = smov [#allocation6]  }
  0x17   :  { %v45_v2 = vsub.s32 0, %v44_v1  ;;  %v49_v3 = vsub.s32 1, %v44_v1  ;;  %s122_s5 = sshll.u32 %s195_s2, 4  ;;  %s123_s5 = int_to_ptr.vmem [resolvable:$true] %s122_s5 }
  0x18   :  { %s165_s6 = scalar_lea.vmem %s123_s5, 256  ;;  %p170_p9 = scmp.lt.s32.totalorder %s123_s5, %s123_s5 }
  0x19   :  { %v46_v7 = vrot.slane %v39_v6, %v45_v2  ;;  %v50_v8 = vrot.slane %v39_v6, %v49_v3  ;;  %v54_v12 = vrot.slane %v40_v11, %v45_v2  ;;  %v58_v13 = vrot.slane %v40_v11, %v49_v3  ;;  %p166_p8 = scmp.ne.s32.totalorder %s123_s5, %s165_s6  ;;  %p171_p10 = scmp.lt.s32.totalorder %s165_s6, %s165_s6 }
  0x1b   :  { %v63_v14 = vmul.f32 %v46_v7, %v35_v4  ;;  %v64_v15 = vmul.f32 %v50_v8, %v36_v5  ;;  %v65_v16 = vmul.f32 %v54_v12, %v37_v9  ;;  %v66_v17 = vmul.f32 %v58_v13, %v38_v10  ;;  %p172_p11 = por %p171_p10, %p170_p9 }
  0x1d   :  { %v67_v18 = vadd.f32 %v64_v15, %v63_v14  ;;  %v68_v19 = vadd.f32 %v66_v17, %v65_v16  ;;  %p173_p12 = pnand %p172_p11, %p166_p8 }
  0x1f   :  { %80 = vadd.xlane.f32.xlu0 %v67_v18 }
  0x23   :  { %82 = vadd.xlane.f32.xlu0 %v68_v19 }
  0xac   :  { %v81_v22 = vpop.xlane.xlu0 %80 }
  0xad   :  { %v86_v23 = vsub.f32 %v84_v21, %v81_v22 }
  0xaf   :  { %v88_v25 = vand.u32 2147483647, %v86_v23 }
  0xb0   :  { %v83_v26 = vpop.xlane.xlu0 %82 }
  0xb1   :  { %v91_v27 = vsel %vm90_vm0, %v88_v25, 0.0  ;;  %v87_v28 = vsub.f32 %v85_v24, %v83_v26 }
  0xb2   :  { %v92_v29 = vrot.slane %v91_v27, 4 }
  0xb3   :  { %v89_v30 = vand.u32 2147483647, %v87_v28 }
  0xb4   :  { %v93_v31 = vadd.f32 %v92_v29, %v91_v27 }
  0xb5   :  { %v98_v32 = vsel %vm90_vm0, %v89_v30, 0.0 }
  0xb6   :  { %v99_v33 = vrot.slane %v98_v32, 4  ;;  %v94_v34 = vrot.slane %v93_v31, 2 }
  0xb8   :  { %v100_v35 = vadd.f32 %v99_v33, %v98_v32  ;;  %v95_v36 = vadd.f32 %v94_v34, %v93_v31 }
  0xba   :  { %v101_v37 = vrot.slane %v100_v35, 2  ;;  %v96_v38 = vrot.slane %v95_v36, 1 }
  0xbc   :  { %v97_v39 = vadd.f32 %v96_v38, %v95_v36  ;;  %v102_v40 = vadd.f32 %v101_v37, %v100_v35 }
  0xbe   :  { %107 = vperm.xlu1 %141, %v97_v39   ;;  %v103_v41 = vrot.slane %v102_v40, 1 }
  0xc0   :  { %v104_v42 = vadd.f32 %v103_v41, %v102_v40 }
  0xc2   :  { %112 = vperm.xlu1 %141, %v104_v42  }
 0x13d   :  { %v108_v43 = vpop.permute.xlu1 %107 }
 0x13e   :  { %115 = vst [vmem:[#allocation6] sm:$0xff] %v108_v43 }
 0x141   :  { %v113_v44 = vpop.permute.xlu1 %112 }
 0x142   :  { %116 = vst [vmem:[#allocation6 + $0x8] sm:$0xff] %v113_v44 }
 0x143   :  { %176 = shalt.err (!%p173_p12)
}
 0x144   :  { %s177_s9 = scalar_lea.hbm %s257_s3, 256 }
 0x145   :  { %p178_p13 = scmp.ne.s32.totalorder %s257_s3, %s177_s9  ;;  %p181_p0 = scmp.lt.u32.totalorder %s177_s9, %s257_s3 }
 0x147   :  { %p183_p1 = pnand %p181_p0, %p178_p13 }
 0x149   :  { %186 = shalt.err (!%p183_p1)
}
 0x14a   :  { %s196_s14 = smov 128   ;;  %s197_s15 = smov 8  }
 0x14b   :  { %128 = dma.vmem_to_hbm [thread:$0]  %s123_s5, 256, %s257_s3, [#allocation5], %s196_s14, %s196_s14, %s197_s15  }
 0x14c   :  { %189 = dma.done.wait [#allocation5], 256  }
 0x14d   :  { %190 = vsyncadd [#allocation5], 4294967040 }
 0x14e   :  { %132 = vsyncpa [#allocation4], 1 }
 0x14f   :  { %133 = vsyncpa [#allocation5], 1 }

</bundles_post_ra>
